<compile_context>
chip_gen: v7x
topology: tpu7x:2x2x1
jax: 0.10.0
libtpu: 0.0.40
codegen_flags: <defaults>
</compile_context>

<pallas_src>
import jax
import jax.numpy as jnp
from jax import lax
from jax.experimental import pallas as pl
from jax.experimental.pallas import tpu as pltpu


def _bilateral_kernel(x_ref, w_ref, b_ref, gamma_ref, beta_ref, o_ref):
    # Blocks: x_ref / o_ref are (Bt, S, H); w_ref is the fused (2H, H) weight
    # ([W_left.T ; W_right.T]); b_ref/gamma_ref/beta_ref are (1, H).
    bt, s, h = x_ref.shape
    x = x_ref[...]                                             # (Bt, S, H)

    if s > 1:
        # torch.roll(x, shifts=+1, dims=1): row i <- row i-1 (wrap-around).
        x_l = jnp.concatenate([x[:, -1:, :], x[:, :-1, :]], axis=1)
        # torch.roll(x, shifts=-1, dims=1): row i <- row i+1 (wrap-around).
        x_r = jnp.concatenate([x[:, 1:, :], x[:, :1, :]], axis=1)
    else:
        x_l = x
        x_r = x

    # Fused operand: lane-concat both rolled copies, flatten batch into the
    # matmul M dimension (S multiple of 8 -> pure sublane-tile relabeling).
    xlr = jnp.concatenate([x_l, x_r], axis=-1).reshape(bt * s, 2 * h)

    # Single MXU matmul for both context Linears; bf16 operands if the caller
    # prepared a bf16 fused weight (v6e/v7x), accumulation always in f32.
    ctx = jnp.dot(xlr.astype(w_ref.dtype), w_ref[...],
                  preferred_element_type=jnp.float32)           # (Bt*S, H)

    enhanced = (x.reshape(bt * s, h).astype(jnp.float32)
                + ctx
                + b_ref[...].astype(jnp.float32))

    # LayerNorm over the hidden (lane) dim, eps=1e-5 (PyTorch default); f32.
    mean = jnp.mean(enhanced, axis=-1, keepdims=True)
    centered = enhanced - mean
    var = jnp.mean(centered * centered, axis=-1, keepdims=True)
    out = centered * lax.rsqrt(var + 1e-5)
    out = out * gamma_ref[...].astype(jnp.float32) + beta_ref[...].astype(jnp.float32)

    o_ref[...] = out.reshape(bt, s, h).astype(o_ref.dtype)


def prepare_params(w_left, b_left, w_right, b_right, ln_gamma, ln_beta,
                   matmul_dtype=jnp.float32):
    """Hoisted (per-model, not per-call) parameter prep.

    w_*: PyTorch nn.Linear layout (out, in). Returns a fused (2H, H) weight in
    `matmul_dtype` (use jnp.bfloat16 on v6e/v7x for MXU peak), the combined
    bias, and f32 LayerNorm affine params.
    """
    h = w_left.shape[0]
    w_fused = jnp.concatenate([w_left.T, w_right.T], axis=0).astype(matmul_dtype)
    b_fused = (b_left + b_right).reshape(1, h).astype(jnp.float32)
    gamma = ln_gamma.reshape(1, h).astype(jnp.float32)
    beta = ln_beta.reshape(1, h).astype(jnp.float32)
    return w_fused, b_fused, gamma, beta


def _pick_batch_block(batch, seq, rows_target=256):
    bt = max(1, min(batch, rows_target // max(1, seq)))
    # Keep >=2 grid steps for dual-TensorCore chips (v7x) when the MXU M-dim
    # budget still allows it.
    if batch // bt < 2 and bt > 1 and (bt // 2) * seq >= 128:
        bt //= 2
    while batch % bt:
        bt -= 1
    return bt


def bilateral_feature_enhancement(x, params, *, batch_block=None):
    """x: (B, S, H). params: output of prepare_params(). Returns (B, S, H).

    Best MXU/store efficiency needs H a multiple of 128 and S a multiple of 8;
    smaller shapes remain correct (Mosaic pads / uses masked stores).
    """
    w_fused, b_fused, gamma, beta = params
    batch, seq, hidden = x.shape
    bt = batch_block if batch_block is not None else _pick_batch_block(batch, seq)
    assert batch % bt == 0, "batch_block must divide batch"
    grid = (batch // bt,)

    act_spec = pl.BlockSpec((bt, seq, hidden), lambda b: (b, 0, 0))
    w_spec = pl.BlockSpec((2 * hidden, hidden), lambda b: (0, 0))
    row_spec = pl.BlockSpec((1, hidden), lambda b: (0, 0))

    itemsize = x.dtype.itemsize
    w_bytes = w_fused.size * w_fused.dtype.itemsize
    cost = pl.CostEstimate(
        flops=2 * batch * seq * (2 * hidden) * hidden + 8 * batch * seq * hidden,
        transcendentals=batch * seq,                       # one rsqrt per row
        bytes_accessed=2 * batch * seq * hidden * itemsize + w_bytes + 3 * hidden * 4,
    )

    cp_kwargs = dict(dimension_semantics=("parallel",))
    # x + out blocks are double-buffered by the pipeline; the weight/bias
    # blocks have constant index_maps so they are fetched once.
    vmem_est = (2 * 2 * bt * seq * hidden * itemsize       # x + out, 2 buffers each
                + 2 * w_bytes                              # fused weight buffers
                + 4 * 2 * hidden * 4)                      # bias / gamma / beta rows
    if vmem_est > 32 * 1024 * 1024:
        # Raise the scoped VMEM limit deliberately; on v7x (64 MiB VMEM) prefer
        # shrinking batch_block instead of pushing this much higher.
        cp_kwargs["vmem_limit_bytes"] = int(min(2 * vmem_est, 100 * 1024 * 1024))

    return pl.pallas_call(
        _bilateral_kernel,
        out_shape=jax.ShapeDtypeStruct((batch, seq, hidden), x.dtype),
        grid_spec=pltpu.PrefetchScalarGridSpec(
            num_scalar_prefetch=0,
            grid=grid,
            in_specs=[act_spec, w_spec, row_spec, row_spec, row_spec],
            out_specs=act_spec,
        ),
        compiler_params=pltpu.CompilerParams(**cp_kwargs),
        cost_estimate=cost,
    )(x, w_fused, b_fused, gamma, beta)


def _reference(x, w_left, b_left, w_right, b_right, ln_gamma, ln_beta):
    x_left = jnp.roll(x, 1, axis=1)
    x_right = jnp.roll(x, -1, axis=1)
    left = x_left @ w_left.T + b_left
    right = x_right @ w_right.T + b_right
    enhanced = x + left + right
    mean = jnp.mean(enhanced, axis=-1, keepdims=True)
    var = jnp.mean((enhanced - mean) ** 2, axis=-1, keepdims=True)
    return (enhanced - mean) / jnp.sqrt(var + 1e-5) * ln_gamma + ln_beta


if __name__ == "__main__":
    B, S, H = 2, 8, 32
    key = jax.random.PRNGKey(0)
    kx, kwl, kbl, kwr, kbr = jax.random.split(key, 5)

    x = jax.random.normal(kx, (B, S, H), dtype=jnp.float32)

    # Deterministic parameter init (shapes match nn.Linear(H, H) / nn.LayerNorm(H)).
    bound = 1.0 / jnp.sqrt(H)
    w_left = jax.random.uniform(kwl, (H, H), minval=-bound, maxval=bound, dtype=jnp.float32)
    b_left = jax.random.uniform(kbl, (H,), minval=-bound, maxval=bound, dtype=jnp.float32)
    w_right = jax.random.uniform(kwr, (H, H), minval=-bound, maxval=bound, dtype=jnp.float32)
    b_right = jax.random.uniform(kbr, (H,), minval=-bound, maxval=bound, dtype=jnp.float32)
    ln_gamma = jnp.ones((H,), dtype=jnp.float32)
    ln_beta = jnp.zeros((H,), dtype=jnp.float32)

    ref = _reference(x, w_left, b_left, w_right, b_right, ln_gamma, ln_beta)

    # f32 MXU path (exact vs reference).
    params = prepare_params(w_left, b_left, w_right, b_right, ln_gamma, ln_beta)
    out = jax.block_until_ready(bilateral_feature_enhancement(x, params))
    assert out.shape == (B, S, H)
    assert jnp.allclose(out, ref, atol=1e-4, rtol=1e-4), "f32 kernel mismatch vs reference"

    # bf16 MXU operands (the v6e/v7x recommendation); LayerNorm stays f32.
    params_bf16 = prepare_params(w_left, b_left, w_right, b_right, ln_gamma, ln_beta,
                                 matmul_dtype=jnp.bfloat16)
    out_bf16 = jax.block_until_ready(bilateral_feature_enhancement(x, params_bf16))
    assert jnp.allclose(out_bf16, ref, atol=5e-2, rtol=0.0), "bf16 kernel mismatch vs reference"

    # TODO(synk): for peak store/MXU efficiency H should be padded/folded to a
    # multiple of 128 (would require masking the LayerNorm mean/var over real
    # lanes); left unpadded here to preserve exact module semantics.
    print("KERNEL_OK")
</pallas_src>

<mosaic_0001>
module attributes {stable_mosaic.version = 11 : i64} {
  func.func @_bilateral_kernel(%arg0: i32, %arg1: memref<2x8x32xf32, #tpu.memory_space<vmem>>, %arg2: memref<64x32xf32, #tpu.memory_space<vmem>>, %arg3: memref<1x32xf32, #tpu.memory_space<vmem>>, %arg4: memref<1x32xf32, #tpu.memory_space<vmem>>, %arg5: memref<1x32xf32, #tpu.memory_space<vmem>>, %arg6: memref<2x8x32xf32, #tpu.memory_space<vmem>>) attributes {dimension_semantics = [#tpu.dimension_semantics<parallel>], iteration_bounds = array<i64: 1>, scalar_prefetch = 0 : i64, scratch_operands = 0 : i64, tpu.core_type = #tpu.core_type<tc>, window_params = [{transform_indices = @transform_0, window_bounds = array<i64: 2, 8, 32>}, {pipeline_mode = #tpu.pipeline_mode<synchronous>, transform_indices = @transform_1, window_bounds = array<i64: 64, 32>}, {pipeline_mode = #tpu.pipeline_mode<synchronous>, transform_indices = @transform_2, window_bounds = array<i64: 1, 32>}, {pipeline_mode = #tpu.pipeline_mode<synchronous>, transform_indices = @transform_3, window_bounds = array<i64: 1, 32>}, {pipeline_mode = #tpu.pipeline_mode<synchronous>, transform_indices = @transform_4, window_bounds = array<i64: 1, 32>}, {transform_indices = @transform_5, window_bounds = array<i64: 2, 8, 32>}]} {
    %c0 = arith.constant 0 : index
    %c0_0 = arith.constant 0 : index
    %c0_1 = arith.constant 0 : index
    %0 = vector.load %arg1[%c0, %c0_0, %c0_1] : memref<2x8x32xf32, #tpu.memory_space<vmem>>, vector<2x8x32xf32>
    %1 = vector.extract_strided_slice %0 {offsets = [0, 7, 0], sizes = [2, 1, 32], strides = [1, 1, 1]} : vector<2x8x32xf32> to vector<2x1x32xf32>
    %2 = vector.extract_strided_slice %0 {offsets = [0, 0, 0], sizes = [2, 7, 32], strides = [1, 1, 1]} : vector<2x8x32xf32> to vector<2x7x32xf32>
    %3 = tpu.concatenate %1, %2 in 1 : vector<2x1x32xf32>, vector<2x7x32xf32> -> vector<2x8x32xf32>
    %4 = vector.extract_strided_slice %0 {offsets = [0, 1, 0], sizes = [2, 7, 32], strides = [1, 1, 1]} : vector<2x8x32xf32> to vector<2x7x32xf32>
    %5 = vector.extract_strided_slice %0 {offsets = [0, 0, 0], sizes = [2, 1, 32], strides = [1, 1, 1]} : vector<2x8x32xf32> to vector<2x1x32xf32>
    %6 = tpu.concatenate %4, %5 in 1 : vector<2x7x32xf32>, vector<2x1x32xf32> -> vector<2x8x32xf32>
    %7 = tpu.concatenate %3, %6 in 2 : vector<2x8x32xf32>, vector<2x8x32xf32> -> vector<2x8x64xf32>
    %8 = vector.shape_cast %7 : vector<2x8x64xf32> to vector<16x64xf32>
    %c0_2 = arith.constant 0 : index
    %c0_3 = arith.constant 0 : index
    %9 = vector.load %arg2[%c0_2, %c0_3] : memref<64x32xf32, #tpu.memory_space<vmem>>, vector<64x32xf32>
    %cst = arith.constant dense<0.000000e+00> : vector<16x32xf32>
    %10 = tpu.matmul %8, %9, %cst {dimension_numbers = #tpu.dot_dimension_numbers<[1], [0], [0], [1], [0, 0, 1, 1], [], []>} : vector<16x64xf32>, vector<64x32xf32>, vector<16x32xf32> -> vector<16x32xf32>
    %11 = vector.shape_cast %0 : vector<2x8x32xf32> to vector<16x32xf32>
    %12 = arith.addf %11, %10 : vector<16x32xf32>
    %c0_4 = arith.constant 0 : index
    %c0_5 = arith.constant 0 : index
    %13 = vector.load %arg3[%c0_4, %c0_5] : memref<1x32xf32, #tpu.memory_space<vmem>>, vector<1x32xf32>
    %14 = vector.broadcast %13 : vector<1x32xf32> to vector<16x32xf32>
    %15 = arith.addf %12, %14 : vector<16x32xf32>
    %cst_6 = arith.constant dense<0.000000e+00> : vector<16xf32>
    %16 = vector.multi_reduction <add>, %15, %cst_6 [1] : vector<16x32xf32> to vector<16xf32>
    %17 = vector.shape_cast %16 : vector<16xf32> to vector<16x1xf32>
    %cst_7 = arith.constant 3.200000e+01 : f32
    %18 = vector.broadcast %cst_7 : f32 to vector<16x1xf32>
    %19 = arith.divf %17, %18 : vector<16x1xf32>
    %20 = vector.broadcast %19 : vector<16x1xf32> to vector<16x32xf32>
    %21 = arith.subf %15, %20 : vector<16x32xf32>
    %22 = arith.mulf %21, %21 : vector<16x32xf32>
    %cst_8 = arith.constant dense<0.000000e+00> : vector<16xf32>
    %23 = vector.multi_reduction <add>, %22, %cst_8 [1] : vector<16x32xf32> to vector<16xf32>
    %24 = vector.shape_cast %23 : vector<16xf32> to vector<16x1xf32>
    %cst_9 = arith.constant 3.200000e+01 : f32
    %25 = vector.broadcast %cst_9 : f32 to vector<16x1xf32>
    %26 = arith.divf %24, %25 : vector<16x1xf32>
    %cst_10 = arith.constant 9.99999974E-6 : f32
    %27 = vector.broadcast %cst_10 : f32 to vector<16x1xf32>
    %28 = arith.addf %26, %27 : vector<16x1xf32>
    %29 = math.rsqrt %28 : vector<16x1xf32>
    %30 = vector.broadcast %29 : vector<16x1xf32> to vector<16x32xf32>
    %31 = arith.mulf %21, %30 : vector<16x32xf32>
    %c0_11 = arith.constant 0 : index
    %c0_12 = arith.constant 0 : index
    %32 = vector.load %arg4[%c0_11, %c0_12] : memref<1x32xf32, #tpu.memory_space<vmem>>, vector<1x32xf32>
    %33 = vector.broadcast %32 : vector<1x32xf32> to vector<16x32xf32>
    %34 = arith.mulf %31, %33 : vector<16x32xf32>
    %c0_13 = arith.constant 0 : index
    %c0_14 = arith.constant 0 : index
    %35 = vector.load %arg5[%c0_13, %c0_14] : memref<1x32xf32, #tpu.memory_space<vmem>>, vector<1x32xf32>
    %36 = vector.broadcast %35 : vector<1x32xf32> to vector<16x32xf32>
    %37 = arith.addf %34, %36 : vector<16x32xf32>
    %38 = vector.shape_cast %37 : vector<16x32xf32> to vector<2x8x32xf32>
    %c0_15 = arith.constant 0 : index
    %c0_16 = arith.constant 0 : index
    %c0_17 = arith.constant 0 : index
    %39 = vector.load %arg6[%c0_15, %c0_16, %c0_17] : memref<2x8x32xf32, #tpu.memory_space<vmem>>, vector<2x8x32xf32>
    tpu.vector_store %arg6[%c0_15, %c0_16, %c0_17], %38 {strides = array<i32>} : memref<2x8x32xf32, #tpu.memory_space<vmem>>, vector<2x8x32xf32>,
    return
  }
  func.func @transform_0(%arg0: i32) -> (i32, i32, i32) {
    %c0_i32 = arith.constant 0 : i32
    %c0_i32_0 = arith.constant 0 : i32
    %c0_i32_1 = arith.constant 0 : i32
    return %arg0, %c0_i32, %c0_i32_0 : i32, i32, i32
  }
  func.func @transform_1(%arg0: i32) -> (i32, i32) {
    %c0_i32 = arith.constant 0 : i32
    %c0_i32_0 = arith.constant 0 : i32
    %c0_i32_1 = arith.constant 0 : i32
    return %c0_i32, %c0_i32_0 : i32, i32
  }
  func.func @transform_2(%arg0: i32) -> (i32, i32) {
    %c0_i32 = arith.constant 0 : i32
    %c0_i32_0 = arith.constant 0 : i32
    %c0_i32_1 = arith.constant 0 : i32
    return %c0_i32, %c0_i32_0 : i32, i32
  }
  func.func @transform_3(%arg0: i32) -> (i32, i32) {
    %c0_i32 = arith.constant 0 : i32
    %c0_i32_0 = arith.constant 0 : i32
    %c0_i32_1 = arith.constant 0 : i32
    return %c0_i32, %c0_i32_0 : i32, i32
  }
  func.func @transform_4(%arg0: i32) -> (i32, i32) {
    %c0_i32 = arith.constant 0 : i32
    %c0_i32_0 = arith.constant 0 : i32
    %c0_i32_1 = arith.constant 0 : i32
    return %c0_i32, %c0_i32_0 : i32, i32
  }
  func.func @transform_5(%arg0: i32) -> (i32, i32, i32) {
    %c0_i32 = arith.constant 0 : i32
    %c0_i32_0 = arith.constant 0 : i32
    %c0_i32_1 = arith.constant 0 : i32
    return %arg0, %c0_i32, %c0_i32_0 : i32, i32, i32
  }
}

</mosaic_0001>

<bundles_post_ra>
// kernel: tpu_custom_call.1
= control target key start
LH: loop header
LB: loop body
LE: loop exit
PB: predicated region body
PF: predicated region fallthrough
CT: control target
= control target key end

     0   :  { %s389_s0 = inlined_call_operand.vmem [shape: f32[2,8,32], index: 0, kind: input, shape index: {}]   ;;  %s390_s1 = inlined_call_operand.vmem [shape: f32[64,32], index: 1, kind: input, shape index: {}]   ;;  %s391_s2 = inlined_call_operand.vmem [shape: f32[1,32], index: 2, kind: input, shape index: {}]   ;;  %s392_s3 = inlined_call_operand.vmem [shape: f32[1,32], index: 3, kind: input, shape index: {}]   ;;  %s393_s4 = inlined_call_operand.vmem [shape: f32[1,32], index: 4, kind: input, shape index: {}]   ;;  %s394_s5 = inlined_call_operand.hbm [shape: f32[2,8,32], index: 5, kind: output, shape index: {}]  }
   0x1   :  { %v21_v0 = vld [vmem:[%s389_s0] sm:$0xff]  ;;  %v22_v1 = vld [vmem:[%s389_s0 + $0x8] sm:$0xff]  ;;  %v52_v5 = vld [vmem:[%s390_s1 + $0x10] sm:$0xff]  ;;  %s296_s0 = smov 32  }
   0x2   :  { %v50_v2 = vld [vmem:[%s390_s1] sm:$0xff]  ;;  %v32_v3 = vrot.slane %v21_v0, 1  ;;  %v51_v4 = vld [vmem:[%s390_s1 + $0x8] sm:$0xff]  ;;  %v53_v6 = vld [vmem:[%s390_s1 + $0x18] sm:$0xff]  ;;  %v33_v9 = vrot.slane %v22_v1, 1 }
   0x3   :  { %v248_v7 = vpack.c.bf16 %v51_v4, %v50_v2  ;;  %v252_v8 = vpack.c.bf16 %v53_v6, %v52_v5  ;;  %v54_v10 = vld [vmem:[%s390_s1 + $0x20] sm:$0xff]  ;;  %v55_v11 = vld [vmem:[%s390_s1 + $0x28] sm:$0xff] }
   0x4   :  { %41 = vrot.lane.b32.xlu0 %v32_v3, %s296_s0 }
   0x5   :  { %10 = vsyncpa [#allocation3], 0  ;;  %249 = vmatprep.subr.bf16.mxu0 %v248_v7  ;;  %v256_v12 = vpack.c.bf16 %v55_v11, %v54_v10  ;;  %v56_v13 = vld [vmem:[%s390_s1 + $0x30] sm:$0xff]  ;;  %v57_v14 = vld [vmem:[%s390_s1 + $0x38] sm:$0xff]  ;;  %v25_v16 = vrot.slane %v21_v0, 7  ;;  %vm47_vm0 = vcmask 261120  }
   0x6   :  { %251 = vmatpush3.bf16.msra.mxu0 %v248_v7  ;;  %v260_v15 = vpack.c.bf16 %v57_v14, %v56_v13  ;;  %vm58_vm1 = vcmask 523264   ;;  %v26_v19 = vrot.slane %v22_v1, 7  ;;  %v216_v24 = vld [vmem:[%s391_s2] ss:$0 sm:$0xff]  ;;  %s297_s17 = smov [#allocation2]  }
   0x7   :  { %253 = vmatprep.subr.bf16.mxu0 %v252_v8  ;;  %v217_v48 = vld [vmem:[%s392_s3] ss:$0 sm:$0xff]  ;;  %s203_s18 = sshll.u32 %s297_s17, 4  ;;  %s204_s18 = int_to_ptr.vmem [resolvable:$true] %s203_s18 }
   0x8   :  { %43 = vrot.lane.b32.xlu0 %v33_v9, %s296_s0  ;;  %v218_v50 = vld [vmem:[%s393_s4] ss:$0 sm:$0xff]  ;;  %s272_s19 = scalar_lea.vmem %s204_s18, 256  ;;  %p277_p1 = scmp.lt.s32.totalorder %s204_s18, %s204_s18 }
   0x9   :  { %p273_p0 = scmp.ne.s32.totalorder %s204_s18, %s272_s19  ;;  %p278_p2 = scmp.lt.s32.totalorder %s272_s19, %s272_s19 }
   0xa   :  { %255 = vmatpush3.bf16.msra.mxu0 %v252_v8 }
   0xb   :  { %257 = vmatprep.subr.bf16.mxu0 %v256_v12  ;;  %p279_p3 = por %p278_p2, %p277_p1 }
   0xd   :  { %p280_p4 = pnand %p279_p3, %p273_p0 }
   0xe   :  { %259 = vmatpush3.bf16.msra.mxu0 %v256_v12 }
   0xf   :  { %261 = vmatprep.subr.bf16.mxu0 %v260_v15 }
  0x12   :  { %263 = vmatpush3.bf16.msra.mxu0 %v260_v15 }
  0x76   :  { %v42_v17 = vpop.permute.xlu0 %41 }
  0x77   :  { %v48_v18 = vsel %vm47_vm0, %v25_v16, %v42_v17 }
  0x78   :  { %245 = vmatprep.mubr.msk.f32.mxu0 %vm58_vm1, %v48_v18 }
  0x7a   :  { %v44_v20 = vpop.permute.xlu0 %43 }
  0x7b   :  { %v49_v21 = vsel %vm47_vm0, %v26_v19, %v44_v20 }
  0x7c   :  { %246 = vmatmul.mubr.msk.f32.vlgmr.msra.gmra.mrb[0].mxu0 %vm58_vm1, %v49_v21 }
 0x14f   :  { %v247_v22 = vpop.f32.mrb[0].mxu0 }
 0x150   :  { %v131_v23 = vpop.f32.mrb[1].mxu0  ;;  %v141_v25 = vadd.f32 %v247_v22, %v22_v1 }
 0x151   :  { %v140_v26 = vadd.f32 %v131_v23, %v21_v0 }
 0x152   :  { %v150_v29 = vadd.f32 %v216_v24, %v141_v25 }
 0x153   :  { %v149_v27 = vadd.f32 %v216_v24, %v140_v26 }
 0x154   :  { %v154_v30 = vsel %vm47_vm0, %v150_v29, 0.0 }
 0x155   :  { %v151_v28 = vsel %vm47_vm0, %v149_v27, 0.0 }
 0x156   :  { %152 = vadd.xlane.f32.xlu1 %v151_v28 }
 0x15a   :  { %155 = vadd.xlane.f32.xlu1 %v154_v30 }
 0x1e3   :  { %v153_v31 = vpop.xlane.xlu1 %152 }
 0x1e4   :  { %v158_v32 = vmul.f32 0.03125, %v153_v31 }
 0x1e6   :  { %v160_v33 = vsub.f32 %v149_v27, %v158_v32 }
 0x1e7   :  { %v156_v34 = vpop.xlane.xlu1 %155 }
 0x1e8   :  { %v159_v35 = vmul.f32 0.03125, %v156_v34  ;;  %v162_v36 = vmul.f32 %v160_v33, %v160_v33 }
 0x1ea   :  { %v161_v37 = vsub.f32 %v150_v29, %v159_v35  ;;  %v164_v38 = vsel %vm47_vm0, %v162_v36, 0.0 }
 0x1eb   :  { %165 = vadd.xlane.f32.xlu0 %v164_v38 }
 0x1ec   :  { %v163_v39 = vmul.f32 %v161_v37, %v161_v37 }
 0x1ee   :  { %v167_v40 = vsel %vm47_vm0, %v163_v39, 0.0 }
 0x1ef   :  { %168 = vadd.xlane.f32.xlu1 %v167_v40 }
 0x278   :  { %v166_v41 = vpop.xlane.xlu0 %165 }
 0x279   :  { %v170_v42 = vmul.f32 0.03125, %v166_v41 }
 0x27b   :  { %v172_v43 = vadd.f32 1e-05, %v170_v42 }
 0x27c   :  { %v169_v44 = vpop.xlane.xlu1 %168 }
 0x27d   :  { %268 = vrsqrt.f32 %v172_v43  ;;  %v171_v45 = vmul.f32 0.03125, %v169_v44 }
 0x27f   :  { %v173_v46 = vadd.f32 1e-05, %v171_v45 }
 0x281   :  { %270 = vrsqrt.f32 %v173_v46 }
 0x287   :  { %v269_v47 = vpop.eup %268 }
 0x288   :  { %v176_v49 = vmul.f32 %v269_v47, %v160_v33 }
 0x28a   :  { %v185_v51 = vmul.f32 %v217_v48, %v176_v49 }
 0x28b   :  { %v271_v52 = vpop.eup %270 }
 0x28c   :  { %v177_v53 = vmul.f32 %v271_v52, %v161_v37  ;;  %v194_v54 = vadd.f32 %v218_v50, %v185_v51 }
 0x28e   :  { %v186_v55 = vmul.f32 %v217_v48, %v177_v53  ;;  %196 = vst.msk [vmem:[#allocation2] sm:$0xff] %vm47_vm0, %v194_v54 }
 0x290   :  { %v195_v56 = vadd.f32 %v218_v50, %v186_v55 }
 0x292   :  { %197 = vst.msk [vmem:[#allocation2 + $0x8] sm:$0xff] %vm47_vm0, %v195_v56 }
 0x293   :  { %283 = shalt.err (!%p280_p4)
}
 0x294   :  { %s284_s20 = scalar_lea.hbm %s394_s5, 256 }
 0x295   :  { %p285_p5 = scmp.ne.s32.totalorder %s394_s5, %s284_s20  ;;  %p288_p6 = scmp.lt.u32.totalorder %s284_s20, %s394_s5 }
 0x297   :  { %p290_p7 = pnand %p288_p6, %p285_p5 }
 0x299   :  { %293 = shalt.err (!%p290_p7)
}
 0x29a   :  { %s298_s25 = smov 128   ;;  %s299_s26 = smov 8  }
 0x29b   :  { %209 = dma.vmem_to_hbm [thread:$0]  %s204_s18, 256, %s394_s5, [#allocation3], %s298_s25, %s298_s25, %s299_s26  }
 0x29c   :  { %294 = dma.done.wait [#allocation3], 256  }
 0x29d   :  { %295 = vsyncadd [#allocation3], 4294967040 }
 0x29e   :  { %213 = vsyncpa [#allocation3], 1 }

</bundles_post_ra>
